<compile_context>
chip_gen: v7x
topology: tpu7x:2x2x1
jax: 0.10.0
libtpu: 0.0.40
codegen_flags: <defaults>
</compile_context>

<pallas_src>
import numpy as np
import jax
import jax.numpy as jnp
from jax import lax
from jax.experimental import pallas as pl
from jax.experimental.pallas import tpu as pltpu

EPS = 1e-5


# ----------------------------- Pallas kernel -------------------------------

def make_resblock_kernel(C, L, K):
    pad = (K - 1) // 2

    def kernel(x_ref, w1_ref, b1_ref, w2_ref, b2_ref, o_ref):
        # x_ref/o_ref: (C, L) for one batch element.
        # w*_ref: (K, C, C) BN-folded (tap, out-channel, in-channel).
        # b*_ref: (C, 1) BN-folded bias.
        x = x_ref[...]

        # Boundary masks: built once, reused by BOTH convs.  Tap k at output
        # position t reads input position t + k - pad; it is valid iff
        # 0 <= t + k - pad < L, i.e. (base + k) as uint32 < L (single compare).
        base = lax.broadcasted_iota(jnp.int32, (C, L), 1) - pad
        masks = [(base + k).astype(jnp.uint32) < jnp.uint32(L) for k in range(K)]

        def conv(v, w_ref, b_ref):
            # Streamed per-tap accumulation: no (K*C, L) im2col materialized.
            acc = jnp.broadcast_to(b_ref[...], (C, L))
            for k in range(K):
                shift = (pad - k) % L              # roll: out[t] = v[t - shift]
                rolled = pltpu.roll(v, shift=shift, axis=1) if shift else v
                tap = jnp.where(masks[k], rolled, 0.0)
                acc = acc + jnp.dot(w_ref[k], tap,
                                    preferred_element_type=jnp.float32)
            return acc

        y1 = conv(x, w1_ref, b1_ref)
        # NOTE: intentionally no ReLU between the two convs (matches the module).
        y2 = conv(y1, w2_ref, b2_ref)
        o_ref[...] = jnp.maximum(x + y2, 0.0)      # residual + ReLU

    return kernel


# ----------------------------- wrapper --------------------------------------

def _fold_bn(w, b, gamma, beta, rmean, rvar):
    # Conv1d weight (Cout, Cin, K), bias (Cout,), eval-mode BN running stats.
    scale = gamma / jnp.sqrt(rvar + EPS)                  # (Cout,)
    w_eff = w * scale[:, None, None]                      # (Cout, Cin, K)
    b_eff = (b - rmean) * scale + beta                    # (Cout,)
    w_tap = jnp.transpose(w_eff, (2, 0, 1))               # (K, Cout, Cin)
    return w_tap, b_eff[:, None]


def resblock_forward(x, p):
    B, C, L = x.shape
    K = p["w1"].shape[2]
    pad = (K - 1) // 2
    assert L > pad, "circular-roll + mask scheme requires L > pad"

    w1t, b1v = _fold_bn(p["w1"], p["b1"], p["g1"], p["be1"], p["rm1"], p["rv1"])
    w2t, b2v = _fold_bn(p["w2"], p["b2"], p["g2"], p["be2"], p["rm2"], p["rv2"])

    kernel = make_resblock_kernel(C, L, K)
    return pl.pallas_call(
        kernel,
        out_shape=jax.ShapeDtypeStruct((B, C, L), jnp.float32),
        grid=(B,),
        in_specs=[
            pl.BlockSpec((pl.Squeezed(), C, L), lambda b: (b, 0, 0)),
            pl.BlockSpec((K, C, C), lambda b: (0, 0, 0)),
            pl.BlockSpec((C, 1), lambda b: (0, 0)),
            pl.BlockSpec((K, C, C), lambda b: (0, 0, 0)),
            pl.BlockSpec((C, 1), lambda b: (0, 0)),
        ],
        out_specs=pl.BlockSpec((pl.Squeezed(), C, L), lambda b: (b, 0, 0)),
        compiler_params=pltpu.CompilerParams(
            dimension_semantics=("parallel",),   # megacore-shardable batch axis
        ),
    )(x, w1t, b1v, w2t, b2v)


# ----------------------------- params / reference ---------------------------

def init_params(key, C, K=9):
    ks = jax.random.split(key, 12)
    nrm = lambda k, shape, s: s * jax.random.normal(k, shape, jnp.float32)
    p = {}
    for i, base in (("1", 0), ("2", 6)):
        p[f"w{i}"] = nrm(ks[base + 0], (C, C, K), 0.1)
        p[f"b{i}"] = nrm(ks[base + 1], (C,), 0.05)
        p[f"g{i}"] = 1.0 + nrm(ks[base + 2], (C,), 0.1)
        p[f"be{i}"] = nrm(ks[base + 3], (C,), 0.1)
        p[f"rm{i}"] = nrm(ks[base + 4], (C,), 0.1)
        p[f"rv{i}"] = 0.8 + 0.4 * jax.random.uniform(ks[base + 5], (C,), jnp.float32)
    return p


def resblock_ref(x, p):
    K = p["w1"].shape[2]
    pad = (K - 1) // 2

    def conv_bn(h, w, b, g, be, rm, rv):
        y = lax.conv_general_dilated(h, w, window_strides=(1,),
                                     padding=[(pad, pad)],
                                     dimension_numbers=("NCH", "OIH", "NCH"))
        y = y + b[None, :, None]
        s = g / jnp.sqrt(rv + EPS)
        return (y - rm[None, :, None]) * s[None, :, None] + be[None, :, None]

    y = conv_bn(x, p["w1"], p["b1"], p["g1"], p["be1"], p["rm1"], p["rv1"])
    y = conv_bn(y, p["w2"], p["b2"], p["g2"], p["be2"], p["rm2"], p["rv2"])
    return jax.nn.relu(x + y)


# ----------------------------- main ------------------------------------------

if __name__ == "__main__":
    key = jax.random.PRNGKey(0)
    pkey, xkey = jax.random.split(key)
    B, C, L = 2, 8, 256          # small shapes; K=9 fixed by the module
    x = jax.random.normal(xkey, (B, C, L), jnp.float32)
    params = init_params(pkey, C)

    out = jax.block_until_ready(jax.jit(resblock_forward)(x, params))

    ref = resblock_ref(x, params)
    assert out.shape == (B, C, L)
    if not np.allclose(np.asarray(out), np.asarray(ref), rtol=1e-3, atol=1e-3):
        raise AssertionError("Pallas result mismatch vs JAX reference")
    print("KERNEL_OK")
</pallas_src>

<mosaic_0001>
module attributes {stable_mosaic.version = 11 : i64} {
  func.func @kernel(%arg0: i32, %arg1: memref<1x8x256xf32, #tpu.memory_space<vmem>>, %arg2: memref<9x8x8xf32, #tpu.memory_space<vmem>>, %arg3: memref<8x1xf32, #tpu.memory_space<vmem>>, %arg4: memref<9x8x8xf32, #tpu.memory_space<vmem>>, %arg5: memref<8x1xf32, #tpu.memory_space<vmem>>, %arg6: memref<1x8x256xf32, #tpu.memory_space<vmem>>) attributes {dimension_semantics = [#tpu.dimension_semantics<parallel>], iteration_bounds = array<i64: 2>, scalar_prefetch = 0 : i64, scratch_operands = 0 : i64, tpu.core_type = #tpu.core_type<tc>, window_params = [{transform_indices = @transform_0, window_bounds = array<i64: 1, 8, 256>}, {pipeline_mode = #tpu.pipeline_mode<synchronous>, transform_indices = @transform_1, window_bounds = array<i64: 9, 8, 8>}, {pipeline_mode = #tpu.pipeline_mode<synchronous>, transform_indices = @transform_2, window_bounds = array<i64: 8, 1>}, {pipeline_mode = #tpu.pipeline_mode<synchronous>, transform_indices = @transform_3, window_bounds = array<i64: 9, 8, 8>}, {pipeline_mode = #tpu.pipeline_mode<synchronous>, transform_indices = @transform_4, window_bounds = array<i64: 8, 1>}, {transform_indices = @transform_5, window_bounds = array<i64: 1, 8, 256>}]} {
    %c0 = arith.constant 0 : index
    %c0_0 = arith.constant 0 : index
    %c0_1 = arith.constant 0 : index
    %0 = vector.load %arg1[%c0, %c0_0, %c0_1] : memref<1x8x256xf32, #tpu.memory_space<vmem>>, vector<1x8x256xf32>
    %1 = vector.shape_cast %0 : vector<1x8x256xf32> to vector<8x256xf32>
    %2 = tpu.iota {dimensions = array<i32: 1>} : vector<8x256xi32>
    %c4_i32 = arith.constant 4 : i32
    %3 = vector.broadcast %c4_i32 : i32 to vector<8x256xi32>
    %4 = arith.subi %2, %3 : vector<8x256xi32>
    %c0_i32 = arith.constant 0 : i32
    %5 = vector.broadcast %c0_i32 : i32 to vector<8x256xi32>
    %6 = arith.addi %4, %5 : vector<8x256xi32>
    %c256_i32 = arith.constant 256 : i32
    %7 = vector.broadcast %c256_i32 : i32 to vector<8x256xi32>
    %8 = arith.cmpi ult, %6, %7 : vector<8x256xi32>
    %c1_i32 = arith.constant 1 : i32
    %9 = vector.broadcast %c1_i32 : i32 to vector<8x256xi32>
    %10 = arith.addi %4, %9 : vector<8x256xi32>
    %c256_i32_2 = arith.constant 256 : i32
    %11 = vector.broadcast %c256_i32_2 : i32 to vector<8x256xi32>
    %12 = arith.cmpi ult, %10, %11 : vector<8x256xi32>
    %c2_i32 = arith.constant 2 : i32
    %13 = vector.broadcast %c2_i32 : i32 to vector<8x256xi32>
    %14 = arith.addi %4, %13 : vector<8x256xi32>
    %c256_i32_3 = arith.constant 256 : i32
    %15 = vector.broadcast %c256_i32_3 : i32 to vector<8x256xi32>
    %16 = arith.cmpi ult, %14, %15 : vector<8x256xi32>
    %c3_i32 = arith.constant 3 : i32
    %17 = vector.broadcast %c3_i32 : i32 to vector<8x256xi32>
    %18 = arith.addi %4, %17 : vector<8x256xi32>
    %c256_i32_4 = arith.constant 256 : i32
    %19 = vector.broadcast %c256_i32_4 : i32 to vector<8x256xi32>
    %20 = arith.cmpi ult, %18, %19 : vector<8x256xi32>
    %c4_i32_5 = arith.constant 4 : i32
    %21 = vector.broadcast %c4_i32_5 : i32 to vector<8x256xi32>
    %22 = arith.addi %4, %21 : vector<8x256xi32>
    %c256_i32_6 = arith.constant 256 : i32
    %23 = vector.broadcast %c256_i32_6 : i32 to vector<8x256xi32>
    %24 = arith.cmpi ult, %22, %23 : vector<8x256xi32>
    %c5_i32 = arith.constant 5 : i32
    %25 = vector.broadcast %c5_i32 : i32 to vector<8x256xi32>
    %26 = arith.addi %4, %25 : vector<8x256xi32>
    %c256_i32_7 = arith.constant 256 : i32
    %27 = vector.broadcast %c256_i32_7 : i32 to vector<8x256xi32>
    %28 = arith.cmpi ult, %26, %27 : vector<8x256xi32>
    %c6_i32 = arith.constant 6 : i32
    %29 = vector.broadcast %c6_i32 : i32 to vector<8x256xi32>
    %30 = arith.addi %4, %29 : vector<8x256xi32>
    %c256_i32_8 = arith.constant 256 : i32
    %31 = vector.broadcast %c256_i32_8 : i32 to vector<8x256xi32>
    %32 = arith.cmpi ult, %30, %31 : vector<8x256xi32>
    %c7_i32 = arith.constant 7 : i32
    %33 = vector.broadcast %c7_i32 : i32 to vector<8x256xi32>
    %34 = arith.addi %4, %33 : vector<8x256xi32>
    %c256_i32_9 = arith.constant 256 : i32
    %35 = vector.broadcast %c256_i32_9 : i32 to vector<8x256xi32>
    %36 = arith.cmpi ult, %34, %35 : vector<8x256xi32>
    %c8_i32 = arith.constant 8 : i32
    %37 = vector.broadcast %c8_i32 : i32 to vector<8x256xi32>
    %38 = arith.addi %4, %37 : vector<8x256xi32>
    %c256_i32_10 = arith.constant 256 : i32
    %39 = vector.broadcast %c256_i32_10 : i32 to vector<8x256xi32>
    %40 = arith.cmpi ult, %38, %39 : vector<8x256xi32>
    %c0_11 = arith.constant 0 : index
    %c0_12 = arith.constant 0 : index
    %41 = vector.load %arg3[%c0_11, %c0_12] : memref<8x1xf32, #tpu.memory_space<vmem>>, vector<8x1xf32>
    %42 = vector.shape_cast %41 : vector<8x1xf32> to vector<8x1xf32>
    %43 = vector.broadcast %42 : vector<8x1xf32> to vector<8x256xf32>
    %c4_i32_13 = arith.constant 4 : i32
    %44 = tpu.dynamic_rotate %1 by %c4_i32_13 dim 1 : vector<8x256xf32>, i32 -> vector<8x256xf32>
    %cst = arith.constant 0.000000e+00 : f32
    %45 = vector.broadcast %cst : f32 to vector<8x256xf32>
    %46 = arith.select %8, %44, %45 : vector<8x256xi1>, vector<8x256xf32>
    %c0_14 = arith.constant 0 : index
    %c0_15 = arith.constant 0 : index
    %c0_16 = arith.constant 0 : index
    %47 = vector.load %arg2[%c0_14, %c0_15, %c0_16] : memref<9x8x8xf32, #tpu.memory_space<vmem>>, vector<1x8x8xf32>
    %48 = vector.shape_cast %47 : vector<1x8x8xf32> to vector<8x8xf32>
    %cst_17 = arith.constant dense<0.000000e+00> : vector<8x256xf32>
    %49 = tpu.matmul %48, %46, %cst_17 {dimension_numbers = #tpu.dot_dimension_numbers<[1], [0], [0], [1], [0, 0, 1, 1], [], []>} : vector<8x8xf32>, vector<8x256xf32>, vector<8x256xf32> -> vector<8x256xf32>
    %50 = arith.addf %43, %49 : vector<8x256xf32>
    %c3_i32_18 = arith.constant 3 : i32
    %51 = tpu.dynamic_rotate %1 by %c3_i32_18 dim 1 : vector<8x256xf32>, i32 -> vector<8x256xf32>
    %cst_19 = arith.constant 0.000000e+00 : f32
    %52 = vector.broadcast %cst_19 : f32 to vector<8x256xf32>
    %53 = arith.select %12, %51, %52 : vector<8x256xi1>, vector<8x256xf32>
    %c1 = arith.constant 1 : index
    %c0_20 = arith.constant 0 : index
    %c0_21 = arith.constant 0 : index
    %54 = vector.load %arg2[%c1, %c0_20, %c0_21] : memref<9x8x8xf32, #tpu.memory_space<vmem>>, vector<1x8x8xf32>
    %55 = vector.shape_cast %54 : vector<1x8x8xf32> to vector<8x8xf32>
    %cst_22 = arith.constant dense<0.000000e+00> : vector<8x256xf32>
    %56 = tpu.matmul %55, %53, %cst_22 {dimension_numbers = #tpu.dot_dimension_numbers<[1], [0], [0], [1], [0, 0, 1, 1], [], []>} : vector<8x8xf32>, vector<8x256xf32>, vector<8x256xf32> -> vector<8x256xf32>
    %57 = arith.addf %50, %56 : vector<8x256xf32>
    %c2_i32_23 = arith.constant 2 : i32
    %58 = tpu.dynamic_rotate %1 by %c2_i32_23 dim 1 : vector<8x256xf32>, i32 -> vector<8x256xf32>
    %cst_24 = arith.constant 0.000000e+00 : f32
    %59 = vector.broadcast %cst_24 : f32 to vector<8x256xf32>
    %60 = arith.select %16, %58, %59 : vector<8x256xi1>, vector<8x256xf32>
    %c2 = arith.constant 2 : index
    %c0_25 = arith.constant 0 : index
    %c0_26 = arith.constant 0 : index
    %61 = vector.load %arg2[%c2, %c0_25, %c0_26] : memref<9x8x8xf32, #tpu.memory_space<vmem>>, vector<1x8x8xf32>
    %62 = vector.shape_cast %61 : vector<1x8x8xf32> to vector<8x8xf32>
    %cst_27 = arith.constant dense<0.000000e+00> : vector<8x256xf32>
    %63 = tpu.matmul %62, %60, %cst_27 {dimension_numbers = #tpu.dot_dimension_numbers<[1], [0], [0], [1], [0, 0, 1, 1], [], []>} : vector<8x8xf32>, vector<8x256xf32>, vector<8x256xf32> -> vector<8x256xf32>
    %64 = arith.addf %57, %63 : vector<8x256xf32>
    %c1_i32_28 = arith.constant 1 : i32
    %65 = tpu.dynamic_rotate %1 by %c1_i32_28 dim 1 : vector<8x256xf32>, i32 -> vector<8x256xf32>
    %cst_29 = arith.constant 0.000000e+00 : f32
    %66 = vector.broadcast %cst_29 : f32 to vector<8x256xf32>
    %67 = arith.select %20, %65, %66 : vector<8x256xi1>, vector<8x256xf32>
    %c3 = arith.constant 3 : index
    %c0_30 = arith.constant 0 : index
    %c0_31 = arith.constant 0 : index
    %68 = vector.load %arg2[%c3, %c0_30, %c0_31] : memref<9x8x8xf32, #tpu.memory_space<vmem>>, vector<1x8x8xf32>
    %69 = vector.shape_cast %68 : vector<1x8x8xf32> to vector<8x8xf32>
    %cst_32 = arith.constant dense<0.000000e+00> : vector<8x256xf32>
    %70 = tpu.matmul %69, %67, %cst_32 {dimension_numbers = #tpu.dot_dimension_numbers<[1], [0], [0], [1], [0, 0, 1, 1], [], []>} : vector<8x8xf32>, vector<8x256xf32>, vector<8x256xf32> -> vector<8x256xf32>
    %71 = arith.addf %64, %70 : vector<8x256xf32>
    %cst_33 = arith.constant 0.000000e+00 : f32
    %72 = vector.broadcast %cst_33 : f32 to vector<8x256xf32>
    %73 = arith.select %24, %1, %72 : vector<8x256xi1>, vector<8x256xf32>
    %c4 = arith.constant 4 : index
    %c0_34 = arith.constant 0 : index
    %c0_35 = arith.constant 0 : index
    %74 = vector.load %arg2[%c4, %c0_34, %c0_35] : memref<9x8x8xf32, #tpu.memory_space<vmem>>, vector<1x8x8xf32>
    %75 = vector.shape_cast %74 : vector<1x8x8xf32> to vector<8x8xf32>
    %cst_36 = arith.constant dense<0.000000e+00> : vector<8x256xf32>
    %76 = tpu.matmul %75, %73, %cst_36 {dimension_numbers = #tpu.dot_dimension_numbers<[1], [0], [0], [1], [0, 0, 1, 1], [], []>} : vector<8x8xf32>, vector<8x256xf32>, vector<8x256xf32> -> vector<8x256xf32>
    %77 = arith.addf %71, %76 : vector<8x256xf32>
    %c255_i32 = arith.constant 255 : i32
    %78 = tpu.dynamic_rotate %1 by %c255_i32 dim 1 : vector<8x256xf32>, i32 -> vector<8x256xf32>
    %cst_37 = arith.constant 0.000000e+00 : f32
    %79 = vector.broadcast %cst_37 : f32 to vector<8x256xf32>
    %80 = arith.select %28, %78, %79 : vector<8x256xi1>, vector<8x256xf32>
    %c5 = arith.constant 5 : index
    %c0_38 = arith.constant 0 : index
    %c0_39 = arith.constant 0 : index
    %81 = vector.load %arg2[%c5, %c0_38, %c0_39] : memref<9x8x8xf32, #tpu.memory_space<vmem>>, vector<1x8x8xf32>
    %82 = vector.shape_cast %81 : vector<1x8x8xf32> to vector<8x8xf32>
    %cst_40 = arith.constant dense<0.000000e+00> : vector<8x256xf32>
    %83 = tpu.matmul %82, %80, %cst_40 {dimension_numbers = #tpu.dot_dimension_numbers<[1], [0], [0], [1], [0, 0, 1, 1], [], []>} : vector<8x8xf32>, vector<8x256xf32>, vector<8x256xf32> -> vector<8x256xf32>
    %84 = arith.addf %77, %83 : vector<8x256xf32>
    %c254_i32 = arith.constant 254 : i32
    %85 = tpu.dynamic_rotate %1 by %c254_i32 dim 1 : vector<8x256xf32>, i32 -> vector<8x256xf32>
    %cst_41 = arith.constant 0.000000e+00 : f32
    %86 = vector.broadcast %cst_41 : f32 to vector<8x256xf32>
    %87 = arith.select %32, %85, %86 : vector<8x256xi1>, vector<8x256xf32>
    %c6 = arith.constant 6 : index
    %c0_42 = arith.constant 0 : index
    %c0_43 = arith.constant 0 : index
    %88 = vector.load %arg2[%c6, %c0_42, %c0_43] : memref<9x8x8xf32, #tpu.memory_space<vmem>>, vector<1x8x8xf32>
    %89 = vector.shape_cast %88 : vector<1x8x8xf32> to vector<8x8xf32>
    %cst_44 = arith.constant dense<0.000000e+00> : vector<8x256xf32>
    %90 = tpu.matmul %89, %87, %cst_44 {dimension_numbers = #tpu.dot_dimension_numbers<[1], [0], [0], [1], [0, 0, 1, 1], [], []>} : vector<8x8xf32>, vector<8x256xf32>, vector<8x256xf32> -> vector<8x256xf32>
    %91 = arith.addf %84, %90 : vector<8x256xf32>
    %c253_i32 = arith.constant 253 : i32
    %92 = tpu.dynamic_rotate %1 by %c253_i32 dim 1 : vector<8x256xf32>, i32 -> vector<8x256xf32>
    %cst_45 = arith.constant 0.000000e+00 : f32
    %93 = vector.broadcast %cst_45 : f32 to vector<8x256xf32>
    %94 = arith.select %36, %92, %93 : vector<8x256xi1>, vector<8x256xf32>
    %c7 = arith.constant 7 : index
    %c0_46 = arith.constant 0 : index
    %c0_47 = arith.constant 0 : index
    %95 = vector.load %arg2[%c7, %c0_46, %c0_47] : memref<9x8x8xf32, #tpu.memory_space<vmem>>, vector<1x8x8xf32>
    %96 = vector.shape_cast %95 : vector<1x8x8xf32> to vector<8x8xf32>
    %cst_48 = arith.constant dense<0.000000e+00> : vector<8x256xf32>
    %97 = tpu.matmul %96, %94, %cst_48 {dimension_numbers = #tpu.dot_dimension_numbers<[1], [0], [0], [1], [0, 0, 1, 1], [], []>} : vector<8x8xf32>, vector<8x256xf32>, vector<8x256xf32> -> vector<8x256xf32>
    %98 = arith.addf %91, %97 : vector<8x256xf32>
    %c252_i32 = arith.constant 252 : i32
    %99 = tpu.dynamic_rotate %1 by %c252_i32 dim 1 : vector<8x256xf32>, i32 -> vector<8x256xf32>
    %cst_49 = arith.constant 0.000000e+00 : f32
    %100 = vector.broadcast %cst_49 : f32 to vector<8x256xf32>
    %101 = arith.select %40, %99, %100 : vector<8x256xi1>, vector<8x256xf32>
    %c8 = arith.constant 8 : index
    %c0_50 = arith.constant 0 : index
    %c0_51 = arith.constant 0 : index
    %102 = vector.load %arg2[%c8, %c0_50, %c0_51] : memref<9x8x8xf32, #tpu.memory_space<vmem>>, vector<1x8x8xf32>
    %103 = vector.shape_cast %102 : vector<1x8x8xf32> to vector<8x8xf32>
    %cst_52 = arith.constant dense<0.000000e+00> : vector<8x256xf32>
    %104 = tpu.matmul %103, %101, %cst_52 {dimension_numbers = #tpu.dot_dimension_numbers<[1], [0], [0], [1], [0, 0, 1, 1], [], []>} : vector<8x8xf32>, vector<8x256xf32>, vector<8x256xf32> -> vector<8x256xf32>
    %105 = arith.addf %98, %104 : vector<8x256xf32>
    %c0_53 = arith.constant 0 : index
    %c0_54 = arith.constant 0 : index
    %106 = vector.load %arg5[%c0_53, %c0_54] : memref<8x1xf32, #tpu.memory_space<vmem>>, vector<8x1xf32>
    %107 = vector.shape_cast %106 : vector<8x1xf32> to vector<8x1xf32>
    %108 = vector.broadcast %107 : vector<8x1xf32> to vector<8x256xf32>
    %c4_i32_55 = arith.constant 4 : i32
    %109 = tpu.dynamic_rotate %105 by %c4_i32_55 dim 1 : vector<8x256xf32>, i32 -> vector<8x256xf32>
    %cst_56 = arith.constant 0.000000e+00 : f32
    %110 = vector.broadcast %cst_56 : f32 to vector<8x256xf32>
    %111 = arith.select %8, %109, %110 : vector<8x256xi1>, vector<8x256xf32>
    %c0_57 = arith.constant 0 : index
    %c0_58 = arith.constant 0 : index
    %c0_59 = arith.constant 0 : index
    %112 = vector.load %arg4[%c0_57, %c0_58, %c0_59] : memref<9x8x8xf32, #tpu.memory_space<vmem>>, vector<1x8x8xf32>
    %113 = vector.shape_cast %112 : vector<1x8x8xf32> to vector<8x8xf32>
    %cst_60 = arith.constant dense<0.000000e+00> : vector<8x256xf32>
    %114 = tpu.matmul %113, %111, %cst_60 {dimension_numbers = #tpu.dot_dimension_numbers<[1], [0], [0], [1], [0, 0, 1, 1], [], []>} : vector<8x8xf32>, vector<8x256xf32>, vector<8x256xf32> -> vector<8x256xf32>
    %115 = arith.addf %108, %114 : vector<8x256xf32>
    %c3_i32_61 = arith.constant 3 : i32
    %116 = tpu.dynamic_rotate %105 by %c3_i32_61 dim 1 : vector<8x256xf32>, i32 -> vector<8x256xf32>
    %cst_62 = arith.constant 0.000000e+00 : f32
    %117 = vector.broadcast %cst_62 : f32 to vector<8x256xf32>
    %118 = arith.select %12, %116, %117 : vector<8x256xi1>, vector<8x256xf32>
    %c1_63 = arith.constant 1 : index
    %c0_64 = arith.constant 0 : index
    %c0_65 = arith.constant 0 : index
    %119 = vector.load %arg4[%c1_63, %c0_64, %c0_65] : memref<9x8x8xf32, #tpu.memory_space<vmem>>, vector<1x8x8xf32>
    %120 = vector.shape_cast %119 : vector<1x8x8xf32> to vector<8x8xf32>
    %cst_66 = arith.constant dense<0.000000e+00> : vector<8x256xf32>
    %121 = tpu.matmul %120, %118, %cst_66 {dimension_numbers = #tpu.dot_dimension_numbers<[1], [0], [0], [1], [0, 0, 1, 1], [], []>} : vector<8x8xf32>, vector<8x256xf32>, vector<8x256xf32> -> vector<8x256xf32>
    %122 = arith.addf %115, %121 : vector<8x256xf32>
    %c2_i32_67 = arith.constant 2 : i32
    %123 = tpu.dynamic_rotate %105 by %c2_i32_67 dim 1 : vector<8x256xf32>, i32 -> vector<8x256xf32>
    %cst_68 = arith.constant 0.000000e+00 : f32
    %124 = vector.broadcast %cst_68 : f32 to vector<8x256xf32>
    %125 = arith.select %16, %123, %124 : vector<8x256xi1>, vector<8x256xf32>
    %c2_69 = arith.constant 2 : index
    %c0_70 = arith.constant 0 : index
    %c0_71 = arith.constant 0 : index
    %126 = vector.load %arg4[%c2_69, %c0_70, %c0_71] : memref<9x8x8xf32, #tpu.memory_space<vmem>>, vector<1x8x8xf32>
    %127 = vector.shape_cast %126 : vector<1x8x8xf32> to vector<8x8xf32>
    %cst_72 = arith.constant dense<0.000000e+00> : vector<8x256xf32>
    %128 = tpu.matmul %127, %125, %cst_72 {dimension_numbers = #tpu.dot_dimension_numbers<[1], [0], [0], [1], [0, 0, 1, 1], [], []>} : vector<8x8xf32>, vector<8x256xf32>, vector<8x256xf32> -> vector<8x256xf32>
    %129 = arith.addf %122, %128 : vector<8x256xf32>
    %c1_i32_73 = arith.constant 1 : i32
    %130 = tpu.dynamic_rotate %105 by %c1_i32_73 dim 1 : vector<8x256xf32>, i32 -> vector<8x256xf32>
    %cst_74 = arith.constant 0.000000e+00 : f32
    %131 = vector.broadcast %cst_74 : f32 to vector<8x256xf32>
    %132 = arith.select %20, %130, %131 : vector<8x256xi1>, vector<8x256xf32>
    %c3_75 = arith.constant 3 : index
    %c0_76 = arith.constant 0 : index
    %c0_77 = arith.constant 0 : index
    %133 = vector.load %arg4[%c3_75, %c0_76, %c0_77] : memref<9x8x8xf32, #tpu.memory_space<vmem>>, vector<1x8x8xf32>
    %134 = vector.shape_cast %133 : vector<1x8x8xf32> to vector<8x8xf32>
    %cst_78 = arith.constant dense<0.000000e+00> : vector<8x256xf32>
    %135 = tpu.matmul %134, %132, %cst_78 {dimension_numbers = #tpu.dot_dimension_numbers<[1], [0], [0], [1], [0, 0, 1, 1], [], []>} : vector<8x8xf32>, vector<8x256xf32>, vector<8x256xf32> -> vector<8x256xf32>
    %136 = arith.addf %129, %135 : vector<8x256xf32>
    %cst_79 = arith.constant 0.000000e+00 : f32
    %137 = vector.broadcast %cst_79 : f32 to vector<8x256xf32>
    %138 = arith.select %24, %105, %137 : vector<8x256xi1>, vector<8x256xf32>
    %c4_80 = arith.constant 4 : index
    %c0_81 = arith.constant 0 : index
    %c0_82 = arith.constant 0 : index
    %139 = vector.load %arg4[%c4_80, %c0_81, %c0_82] : memref<9x8x8xf32, #tpu.memory_space<vmem>>, vector<1x8x8xf32>
    %140 = vector.shape_cast %139 : vector<1x8x8xf32> to vector<8x8xf32>
    %cst_83 = arith.constant dense<0.000000e+00> : vector<8x256xf32>
    %141 = tpu.matmul %140, %138, %cst_83 {dimension_numbers = #tpu.dot_dimension_numbers<[1], [0], [0], [1], [0, 0, 1, 1], [], []>} : vector<8x8xf32>, vector<8x256xf32>, vector<8x256xf32> -> vector<8x256xf32>
    %142 = arith.addf %136, %141 : vector<8x256xf32>
    %c255_i32_84 = arith.constant 255 : i32
    %143 = tpu.dynamic_rotate %105 by %c255_i32_84 dim 1 : vector<8x256xf32>, i32 -> vector<8x256xf32>
    %cst_85 = arith.constant 0.000000e+00 : f32
    %144 = vector.broadcast %cst_85 : f32 to vector<8x256xf32>
    %145 = arith.select %28, %143, %144 : vector<8x256xi1>, vector<8x256xf32>
    %c5_86 = arith.constant 5 : index
    %c0_87 = arith.constant 0 : index
    %c0_88 = arith.constant 0 : index
    %146 = vector.load %arg4[%c5_86, %c0_87, %c0_88] : memref<9x8x8xf32, #tpu.memory_space<vmem>>, vector<1x8x8xf32>
    %147 = vector.shape_cast %146 : vector<1x8x8xf32> to vector<8x8xf32>
    %cst_89 = arith.constant dense<0.000000e+00> : vector<8x256xf32>
    %148 = tpu.matmul %147, %145, %cst_89 {dimension_numbers = #tpu.dot_dimension_numbers<[1], [0], [0], [1], [0, 0, 1, 1], [], []>} : vector<8x8xf32>, vector<8x256xf32>, vector<8x256xf32> -> vector<8x256xf32>
    %149 = arith.addf %142, %148 : vector<8x256xf32>
    %c254_i32_90 = arith.constant 254 : i32
    %150 = tpu.dynamic_rotate %105 by %c254_i32_90 dim 1 : vector<8x256xf32>, i32 -> vector<8x256xf32>
    %cst_91 = arith.constant 0.000000e+00 : f32
    %151 = vector.broadcast %cst_91 : f32 to vector<8x256xf32>
    %152 = arith.select %32, %150, %151 : vector<8x256xi1>, vector<8x256xf32>
    %c6_92 = arith.constant 6 : index
    %c0_93 = arith.constant 0 : index
    %c0_94 = arith.constant 0 : index
    %153 = vector.load %arg4[%c6_92, %c0_93, %c0_94] : memref<9x8x8xf32, #tpu.memory_space<vmem>>, vector<1x8x8xf32>
    %154 = vector.shape_cast %153 : vector<1x8x8xf32> to vector<8x8xf32>
    %cst_95 = arith.constant dense<0.000000e+00> : vector<8x256xf32>
    %155 = tpu.matmul %154, %152, %cst_95 {dimension_numbers = #tpu.dot_dimension_numbers<[1], [0], [0], [1], [0, 0, 1, 1], [], []>} : vector<8x8xf32>, vector<8x256xf32>, vector<8x256xf32> -> vector<8x256xf32>
    %156 = arith.addf %149, %155 : vector<8x256xf32>
    %c253_i32_96 = arith.constant 253 : i32
    %157 = tpu.dynamic_rotate %105 by %c253_i32_96 dim 1 : vector<8x256xf32>, i32 -> vector<8x256xf32>
    %cst_97 = arith.constant 0.000000e+00 : f32
    %158 = vector.broadcast %cst_97 : f32 to vector<8x256xf32>
    %159 = arith.select %36, %157, %158 : vector<8x256xi1>, vector<8x256xf32>
    %c7_98 = arith.constant 7 : index
    %c0_99 = arith.constant 0 : index
    %c0_100 = arith.constant 0 : index
    %160 = vector.load %arg4[%c7_98, %c0_99, %c0_100] : memref<9x8x8xf32, #tpu.memory_space<vmem>>, vector<1x8x8xf32>
    %161 = vector.shape_cast %160 : vector<1x8x8xf32> to vector<8x8xf32>
    %cst_101 = arith.constant dense<0.000000e+00> : vector<8x256xf32>
    %162 = tpu.matmul %161, %159, %cst_101 {dimension_numbers = #tpu.dot_dimension_numbers<[1], [0], [0], [1], [0, 0, 1, 1], [], []>} : vector<8x8xf32>, vector<8x256xf32>, vector<8x256xf32> -> vector<8x256xf32>
    %163 = arith.addf %156, %162 : vector<8x256xf32>
    %c252_i32_102 = arith.constant 252 : i32
    %164 = tpu.dynamic_rotate %105 by %c252_i32_102 dim 1 : vector<8x256xf32>, i32 -> vector<8x256xf32>
    %cst_103 = arith.constant 0.000000e+00 : f32
    %165 = vector.broadcast %cst_103 : f32 to vector<8x256xf32>
    %166 = arith.select %40, %164, %165 : vector<8x256xi1>, vector<8x256xf32>
    %c8_104 = arith.constant 8 : index
    %c0_105 = arith.constant 0 : index
    %c0_106 = arith.constant 0 : index
    %167 = vector.load %arg4[%c8_104, %c0_105, %c0_106] : memref<9x8x8xf32, #tpu.memory_space<vmem>>, vector<1x8x8xf32>
    %168 = vector.shape_cast %167 : vector<1x8x8xf32> to vector<8x8xf32>
    %cst_107 = arith.constant dense<0.000000e+00> : vector<8x256xf32>
    %169 = tpu.matmul %168, %166, %cst_107 {dimension_numbers = #tpu.dot_dimension_numbers<[1], [0], [0], [1], [0, 0, 1, 1], [], []>} : vector<8x8xf32>, vector<8x256xf32>, vector<8x256xf32> -> vector<8x256xf32>
    %170 = arith.addf %163, %169 : vector<8x256xf32>
    %171 = arith.addf %1, %170 : vector<8x256xf32>
    %cst_108 = arith.constant 0.000000e+00 : f32
    %172 = vector.broadcast %cst_108 : f32 to vector<8x256xf32>
    %173 = arith.maximumf %171, %172 : vector<8x256xf32>
    %c0_109 = arith.constant 0 : index
    %c0_110 = arith.constant 0 : index
    %c0_111 = arith.constant 0 : index
    %174 = vector.load %arg6[%c0_109, %c0_110, %c0_111] : memref<1x8x256xf32, #tpu.memory_space<vmem>>, vector<1x8x256xf32>
    %175 = vector.shape_cast %174 : vector<1x8x256xf32> to vector<8x256xf32>
    %176 = vector.shape_cast %173 : vector<8x256xf32> to vector<1x8x256xf32>
    tpu.vector_store %arg6[%c0_109, %c0_110, %c0_111], %176 {strides = array<i32>} : memref<1x8x256xf32, #tpu.memory_space<vmem>>, vector<1x8x256xf32>,
    return
  }
  func.func @transform_0(%arg0: i32) -> (i32, i32, i32) {
    %c0_i32 = arith.constant 0 : i32
    %c0_i32_0 = arith.constant 0 : i32
    %c0_i32_1 = arith.constant 0 : i32
    return %arg0, %c0_i32, %c0_i32_0 : i32, i32, i32
  }
  func.func @transform_1(%arg0: i32) -> (i32, i32, i32) {
    %c0_i32 = arith.constant 0 : i32
    %c0_i32_0 = arith.constant 0 : i32
    %c0_i32_1 = arith.constant 0 : i32
    %c0_i32_2 = arith.constant 0 : i32
    return %c0_i32, %c0_i32_0, %c0_i32_1 : i32, i32, i32
  }
  func.func @transform_2(%arg0: i32) -> (i32, i32) {
    %c0_i32 = arith.constant 0 : i32
    %c0_i32_0 = arith.constant 0 : i32
    %c0_i32_1 = arith.constant 0 : i32
    return %c0_i32, %c0_i32_0 : i32, i32
  }
  func.func @transform_3(%arg0: i32) -> (i32, i32, i32) {
    %c0_i32 = arith.constant 0 : i32
    %c0_i32_0 = arith.constant 0 : i32
    %c0_i32_1 = arith.constant 0 : i32
    %c0_i32_2 = arith.constant 0 : i32
    return %c0_i32, %c0_i32_0, %c0_i32_1 : i32, i32, i32
  }
  func.func @transform_4(%arg0: i32) -> (i32, i32) {
    %c0_i32 = arith.constant 0 : i32
    %c0_i32_0 = arith.constant 0 : i32
    %c0_i32_1 = arith.constant 0 : i32
    return %c0_i32, %c0_i32_0 : i32, i32
  }
  func.func @transform_5(%arg0: i32) -> (i32, i32, i32) {
    %c0_i32 = arith.constant 0 : i32
    %c0_i32_0 = arith.constant 0 : i32
    %c0_i32_1 = arith.constant 0 : i32
    return %arg0, %c0_i32, %c0_i32_0 : i32, i32, i32
  }
}

</mosaic_0001>

<bundles_post_ra>
// kernel: resblock_forward.1
= control target key start
LH: loop header
LB: loop body
LE: loop exit
PB: predicated region body
PF: predicated region fallthrough
CT: control target
= control target key end

     0   :  { %10 = vsyncpa [#allocation3], 0  ;;  %s2541_s0 = inlined_call_operand.vmem [shape: f32[2,8,256], index: 0, kind: input, shape index: {}]   ;;  %s2542_s1 = inlined_call_operand.vmem [shape: f32[9,8,8], index: 1, kind: input, shape index: {}]   ;;  %s2543_s2 = inlined_call_operand.vmem [shape: f32[8,1], index: 2, kind: input, shape index: {}]   ;;  %s2544_s3 = inlined_call_operand.vmem [shape: f32[9,8,8], index: 3, kind: input, shape index: {}]   ;;  %s2545_s4 = inlined_call_operand.vmem [shape: f32[8,1], index: 4, kind: input, shape index: {}]   ;;  %s2546_s5 = inlined_call_operand.hbm [shape: f32[2,8,256], index: 5, kind: output, shape index: {}]  }
   0x1   :  { %12 = vsyncpa [#allocation3 + $0x1], 0  ;;  %s2154_s18 = smov 0   ;;  %s2156_s19 = smov 0  }
   0x2   :  { %s2158_s20 = smov 0   ;;  %s2160_s21 = smov 0  }
   0x3 LB: > { %s2175_s22 = sadd.s32 4294967295, %s2111_s21   ;;  %s1897_s23 = sadd.s32 4294967294, %s2111_s21   ;;  %s2111_s21 = sphi %s2160_s21, %s2554_s21   ;;  %s2107_s20 = sphi %s2158_s20, %s2553_s20   ;;  %s2103_s19 = sphi %s2156_s19, %s2552_s19   ;;  %s2099_s18 = sphi %s2154_s18, %s2551_s18  }
   0x4   : > { %s2179_s24 = sadd.s32 1, %s2111_s21   ;;  %s135_s25 = sadd.s32 1, %s2107_s20 }
   0x5   : > { %s132_s26 = ssub.s32 %s2111_s21, %s2179_s24  ;;  %p145_p0 = scmp.ne.s32.totalorder %s2107_s20, %s2103_s19 }
   0x6   : > { %p133_p1 = scmp.eq.s32.totalorder %s132_s26, 0  ;;  %p146_p2 = scmp.eq.s32.totalorder %s2175_s22, 1 }
   0x7   : > { %p151_p3 = scmp.ne.s32.totalorder %s2103_s19, %s2099_s18  ;;  %p152_p4 = scmp.eq.s32.totalorder %s1897_s23, 1 }
   0x8   : > { %s2190_s27 = scalar_select %p133_p1, %s2107_s20, %s135_s25  }
   0x9   : > { %p2192_p5 = por %p146_p2, %p145_p0  ;;  %p2196_p6 = por %p152_p4, %p151_p3 }
   0xa   : > { %p1900_p7 = scmp.ge.s32.totalorder %s2111_s21, 1  ;;  %p190_p8 = scmp.lt.s32.totalorder %s2111_s21, 3 }
   0xc   : > { %p191_p9 = pnand %p1900_p7, %p190_p8 }
   0xd   : > { %p218_p10 = scmp.lt.s32.totalorder (!%p191_p9), %s2175_s22, 1  ;;  %v2113_v0 = vmov (!%p191_p9), 0.0   ;;  %s2114_s10 = smov (!%p191_p9), 3   ;;  %v262_v3 = vld [vmem:[%s2543_s2] sm:$0xff] (!%p191_p9)  ;;  %v2122_v4 = vmov (!%p191_p9), 0   ;;  %v225_v5 = vlaneseq (!%p191_p9)  ;;  %vm278_vm3 = vcmask (!%p191_p9), 64512  }
   0xe   : > { %194 = sbr.rel (%p191_p9) target bundleno = 845 (0x34d), region = 40  ;;  %346 = vmatprep.mubr.f32.mxu0 (!%p191_p9), %v2113_v0  ;;  %1126 = vmatprep.mubr.f32.mxu1 (!%p191_p9), %v2113_v0  ;;  %s2115_s11 = smov (!%p191_p9), 4   ;;  %v277_v15 = vld [vmem:[%s2542_s1] sm:$0xff] (!%p191_p9)  ;;  %v1908_v24 = vld [vmem:[%s2542_s1 + $0x8] sm:$0xff] (!%p191_p9)  ;;  %v1911_v29 = vld [vmem:[%s2542_s1 + $0x10] sm:$0xff] (!%p191_p9) }
   0xf   : > { %s2116_s12 = smov (!%p191_p9), 2   ;;  %s2117_s13 = smov (!%p191_p9), 1   ;;  %2048 = vset.pattern.permute.xlu0 (!%p191_p9), %v2122_v4  ;;  %v2248_v6 = vand.u32 (!%p191_p9), 127, %v225_v5  ;;  %v1914_v35 = vld [vmem:[%s2542_s1 + $0x18] sm:$0xff] (!%p191_p9)  ;;  %v1917_v40 = vld [vmem:[%s2542_s1 + $0x20] sm:$0xff] (!%p191_p9)  ;;  %v1919_v46 = vld [vmem:[%s2542_s1 + $0x28] sm:$0xff] (!%p191_p9) }
  0x10   : > { %s2118_s14 = smov (!%p191_p9), 127   ;;  %s2119_s15 = smov (!%p191_p9), 126   ;;  %v1922_v52 = vld [vmem:[%s2542_s1 + $0x30] sm:$0xff] (!%p191_p9)  ;;  %v1925_v55 = vld [vmem:[%s2542_s1 + $0x38] sm:$0xff] (!%p191_p9)  ;;  %v1928_v57 = vld [vmem:[%s2542_s1 + $0x40] sm:$0xff] (!%p191_p9) }
  0x11   : > { %s2120_s16 = smov (!%p191_p9), 125   ;;  %s2121_s17 = smov (!%p191_p9), 124   ;;  %v2251_v7 = vadd.s32 (!%p191_p9), 4294967292, %v2248_v6  ;;  %vm359_vm0 = vcmp.lt.s32.totalorder (!%p191_p9), %v2248_v6, 3  ;;  %vm272_vm1 = vcmp.lt.s32.totalorder (!%p191_p9), %v2248_v6, 4  ;;  %vm446_vm5 = vcmp.lt.s32.totalorder (!%p191_p9), %v2248_v6, 2 }
  0x12   : > { %vm533_vm6 = vcmp.lt.s32.totalorder (!%p191_p9), %v2248_v6, 1  ;;  %v227_v28 = vadd.s32 (!%p191_p9), 128, %v2248_v6  ;;  %vm700_vm9 = vcmp.lt.s32.totalorder (!%p191_p9), %v2248_v6, 127  ;;  %vm787_vm11 = vcmp.lt.s32.totalorder (!%p191_p9), %v2248_v6, 126  ;;  %v1044_v63 = vld [vmem:[%s2545_s4] sm:$0xff] (!%p191_p9)  ;;  %s2123_s25 = smov (!%p191_p9), [#allocation2]  }
  0x13   : > { %v2256_v10 = vadd.s32 (!%p191_p9), 1, %v2251_v7  ;;  %vm230_vm2 = vcmp.lt.u32.totalorder (!%p191_p9), %v2251_v7, 256  ;;  %v2281_v21 = vadd.s32 (!%p191_p9), 2, %v2251_v7  ;;  %v2297_v27 = vadd.s32 (!%p191_p9), 3, %v2251_v7  ;;  %s2053_s26 = sshll.u32 (!%p191_p9), %s2123_s25, 4  ;;  %s2054_s26 = int_to_ptr.vmem [resolvable:$false] %s2053_s26 }
  0x14   : > { %v1905_v31 = vadd.s32 (!%p191_p9), 4294967292, %v227_v28  ;;  %vm874_vm13 = vcmp.lt.s32.totalorder (!%p191_p9), %v2248_v6, 125  ;;  %vm961_vm15 = vcmp.lt.s32.totalorder (!%p191_p9), %v2248_v6, 124 }
  0x15   : > { %s219_s30 = scalar_select %p218_p10, %s2175_s22, 1  ;;  %vm234_vm4 = vcmp.lt.u32.totalorder %v2256_v10, 256  ;;  %vm238_vm7 = vcmp.lt.u32.totalorder %v2281_v21, 256  ;;  %vm242_vm8 = vcmp.lt.u32.totalorder %v2297_v27, 256  ;;  %v1939_v21 = vld [vmem:[%s2544_s3 + $0x18] sm:$0xff]  ;;  %v1942_v27 = vld [vmem:[%s2544_s3 + $0x20] sm:$0xff] }
  0x16   : > { %v2311_v32 = vadd.s32 5, %v1905_v31  ;;  %v2325_v37 = vadd.s32 6, %v1905_v31  ;;  %v2340_v43 = vadd.s32 7, %v1905_v31  ;;  %v2355_v49 = vadd.s32 8, %v1905_v31 }
  0x17   : > { %s1961_s6 = sshll.u32 %s219_s30, 4  ;;  %s2055_s30 = scalar_lea.vmem %s2054_s26, 512 }
  0x18   : > { %s222_s9 = scalar_lea.vmem %s2541_s0, %s1961_s6  ;;  %vm249_vm10 = vcmp.lt.u32.totalorder %v2311_v32, 256  ;;  %vm2547_vm12 = vcmp.lt.u32.totalorder %v2325_v37, 256  ;;  %vm257_vm14 = vcmp.lt.u32.totalorder %v2340_v43, 256  ;;  %v1944_v32 = vld [vmem:[%s2544_s3 + $0x28] sm:$0xff] }
  0x19   : > { %v2209_v1 = vld [vmem:[%s222_s9] sm:$0xff]  ;;  %v2215_v2 = vld [vmem:[%s222_s9 + $0x8] sm:$0xff] }
  0x1a   : > { %355 = vrot.lane.b32.xlu1 %v2209_v1, %s2114_s10  ;;  %268 = vrot.lane.b32.xlu0 %v2209_v1, %s2115_s11 }
  0x1e   : > { %357 = vrot.lane.b32.xlu1 %v2215_v2, %s2114_s10  ;;  %270 = vrot.lane.b32.xlu0 %v2215_v2, %s2115_s11 }
  0x22   : > { %444 = vrot.lane.b32.xlu1 %v2215_v2, %s2116_s12  ;;  %442 = vrot.lane.b32.xlu0 %v2209_v1, %s2116_s12 }
  0x26   : > { %531 = vrot.lane.b32.xlu1 %v2215_v2, %s2117_s13  ;;  %529 = vrot.lane.b32.xlu0 %v2209_v1, %s2117_s13 }
  0x2a   : > { %698 = vrot.lane.b32.xlu1 %v2215_v2, %s2118_s14  ;;  %696 = vrot.lane.b32.xlu0 %v2209_v1, %s2118_s14 }
  0x2e   : > { %785 = vrot.lane.b32.xlu1 %v2215_v2, %s2119_s15  ;;  %783 = vrot.lane.b32.xlu0 %v2209_v1, %s2119_s15 }
  0x32   : > { %872 = vrot.lane.b32.xlu1 %v2215_v2, %s2120_s16  ;;  %870 = vrot.lane.b32.xlu0 %v2209_v1, %s2120_s16 }
  0x36   : > { %959 = vrot.lane.b32.xlu1 %v2215_v2, %s2121_s17  ;;  %957 = vrot.lane.b32.xlu0 %v2209_v1, %s2121_s17 }
  0x3a   : > { %265 = vperm.xlu0 %2048, %v262_v3  }
  0x8c   : > { %v356_v8 = vpop.permute.xlu1 %355  ;;  %v269_v9 = vpop.permute.xlu0 %268 }
  0x90   : > { %v358_v11 = vpop.permute.xlu1 %357  ;;  %v271_v12 = vpop.permute.xlu0 %270 }
  0x91   : > { %v273_v13 = vsel %vm272_vm1, %v269_v9, %v271_v12  ;;  %v274_v14 = vsel %vm272_vm1, %v271_v12, %v269_v9  ;;  %v360_v16 = vsel %vm359_vm0, %v356_v8, %v358_v11  ;;  %v361_v17 = vsel %vm359_vm0, %v358_v11, %v356_v8  ;;  %v1058_v11 = vld [vmem:[%s2544_s3] sm:$0xff] }
  0x92   : > { %282 = vmatprep.subr.mxu0 %v273_v13 }
  0x93   : > { %1906 = vmatpush1.msk.msra.mxu0 %vm230_vm2, %v274_v14 }
  0x94   : > { %1907 = vmatmul.mubr.msk.f32.vlgmr.msra.gmra.mrb[0].mxu0 %vm278_vm3, %v277_v15  ;;  %369 = vmatprep.subr.mxu0 %v360_v16  ;;  %v445_v18 = vpop.permute.xlu1 %444  ;;  %v443_v19 = vpop.permute.xlu0 %442 }
  0x95   : > { %1909 = vmatpush1.msk.msra.mxu0 %vm234_vm4, %v361_v17  ;;  %433 = vmatprep.mubr.f32.mxu0 %v2113_v0  ;;  %v447_v20 = vsel %vm446_vm5, %v443_v19, %v445_v18  ;;  %v448_v25 = vsel %vm446_vm5, %v445_v18, %v443_v19  ;;  %v1933_v17 = vld [vmem:[%s2544_s3 + $0x8] sm:$0xff] }
  0x96   : > { %456 = vmatprep.subr.mxu0 %v447_v20 }
  0x98   : > { %v532_v22 = vpop.permute.xlu1 %531  ;;  %v530_v23 = vpop.permute.xlu0 %529 }
  0x99   : > { %v534_v26 = vsel %vm533_vm6, %v530_v23, %v532_v22  ;;  %v535_v30 = vsel %vm533_vm6, %v532_v22, %v530_v23  ;;  %v1936_v22 = vld [vmem:[%s2544_s3 + $0x10] sm:$0xff] }
  0x9c   : > { %1910 = vmatmul.mubr.msk.f32.vlgmr.msra.gmra.mrb[0].mxu0 %vm278_vm3, %v1908_v24  ;;  %v699_v33 = vpop.permute.xlu1 %698  ;;  %v697_v34 = vpop.permute.xlu0 %696 }
  0x9d   : > { %1912 = vmatpush1.msk.msra.mxu0 %vm238_vm7, %v448_v25  ;;  %520 = vmatprep.mubr.f32.mxu0 %v2113_v0  ;;  %v702_v36 = vsel %vm700_vm9, %v699_v33, %v697_v34  ;;  %v701_v41 = vsel %vm700_vm9, %v697_v34, %v699_v33 }
  0x9e   : > { %543 = vmatprep.subr.mxu0 %v534_v26 }
  0xa0   : > { %v786_v38 = vpop.permute.xlu1 %785  ;;  %v784_v39 = vpop.permute.xlu0 %783 }
  0xa1   : > { %v789_v42 = vsel %vm787_vm11, %v786_v38, %v784_v39  ;;  %v788_v47 = vsel %vm787_vm11, %v784_v39, %v786_v38 }
  0xa4   : > { %1913 = vmatmul.mubr.msk.f32.vlgmr.msra.gmra.mrb[0].mxu0 %vm278_vm3, %v1911_v29  ;;  %v873_v44 = vpop.permute.xlu1 %872  ;;  %v871_v45 = vpop.permute.xlu0 %870 }
  0xa5   : > { %1915 = vmatpush1.msk.msra.mxu0 %vm242_vm8, %v535_v30  ;;  %607 = vmatprep.mubr.f32.mxu0 %v2113_v0  ;;  %v876_v48 = vsel %vm874_vm13, %v873_v44, %v871_v45  ;;  %v875_v53 = vsel %vm874_vm13, %v871_v45, %v873_v44  ;;  %v1953_v44 = vld [vmem:[%s2544_s3 + $0x40] sm:$0xff] }
  0xa6   : > { %623 = vmatprep.subr.mxu0 %v2215_v2 }
  0xa8   : > { %v960_v50 = vpop.permute.xlu1 %959  ;;  %v958_v51 = vpop.permute.xlu0 %957 }
  0xa9   : > { %v963_v54 = vsel %vm961_vm15, %v960_v50, %v958_v51  ;;  %v962_v56 = vsel %vm961_vm15, %v958_v51, %v960_v50 }
  0xac   : > { %1916 = vmatmul.mubr.msk.f32.vlgmr.msra.gmra.mrb[0].mxu0 %vm278_vm3, %v1914_v35 }
  0xad   : > { %624 = vmatpush1.msra.mxu0 %v2209_v1  ;;  %687 = vmatprep.mubr.f32.mxu0 %v2113_v0 }
  0xae   : > { %1920 = vmatprep.subr.msk.mxu0 %vm249_vm10, %v702_v36 }
  0xb4   : > { %1918 = vmatmul.mubr.msk.f32.vlgmr.msra.gmra.mrb[0].mxu0 %vm278_vm3, %v1917_v40 }
  0xb5   : > { %711 = vmatpush1.msra.mxu0 %v701_v41  ;;  %774 = vmatprep.mubr.f32.mxu0 %v2113_v0 }
  0xb6   : > { %1923 = vmatprep.subr.msk.mxu0 %vm2547_vm12, %v789_v42  ;;  %vm261_vm12 = vcmp.lt.u32.totalorder %v2355_v49, 256  ;;  %v1950_v42 = vld [vmem:[%s2544_s3 + $0x38] sm:$0xff] }
  0xb9   : > { %v266_v58 = vpop.permute.xlu0 %265 }
  0xbc   : > { %1921 = vmatmul.mubr.msk.f32.vlgmr.msra.gmra.mrb[0].mxu0 %vm278_vm3, %v1919_v46 }
  0xbd   : > { %798 = vmatpush1.msra.mxu0 %v788_v47  ;;  %861 = vmatprep.mubr.f32.mxu0 %v2113_v0 }
  0xbe   : > { %1926 = vmatprep.subr.msk.mxu0 %vm257_vm14, %v876_v48 }
  0xc4   : > { %1924 = vmatmul.mubr.msk.f32.vlgmr.msra.gmra.mrb[0].mxu0 %vm278_vm3, %v1922_v52 }
  0xc5   : > { %885 = vmatpush1.msra.mxu0 %v875_v53  ;;  %948 = vmatprep.mubr.f32.mxu0 %v2113_v0 }
  0xc6   : > { %1929 = vmatprep.subr.msk.mxu0 %vm261_vm12, %v963_v54 }
  0xcc   : > { %1927 = vmatmul.mubr.msk.f32.vlgmr.msra.gmra.mrb[0].mxu0 %vm278_vm3, %v1925_v55 }
  0xcd   : > { %972 = vmatpush1.msra.mxu0 %v962_v56  ;;  %1035 = vmatprep.mubr.f32.mxu0 %v2113_v0 }
  0xd4   : > { %1930 = vmatmul.mubr.msk.f32.vlgmr.msra.gmra.mrb[0].mxu0 %vm278_vm3, %v1928_v57 }
 0x1a7   : > { %v1037_v59 = vpop.f32.mrb[0].mxu0 }
 0x1a8   : > { %v1963_v60 = vadd.f32 %v1037_v59, %v266_v58  ;;  %v1039_v61 = vpop.f32.mrb[1].mxu0 }
 0x1a9   : > { %v1964_v62 = vadd.f32 %v1039_v61, %v266_v58 }
 0x1aa   : > { %1135 = vrot.lane.b32.xlu0 %v1963_v60, %s2114_s10  ;;  %1050 = vrot.lane.b32.xlu1 %v1963_v60, %s2115_s11 }
 0x1ae   : > { %1221 = vrot.lane.b32.xlu0 %v1963_v60, %s2116_s12  ;;  %1052 = vrot.lane.b32.xlu1 %v1964_v62, %s2115_s11 }
 0x1b2   : > { %1307 = vrot.lane.b32.xlu0 %v1963_v60, %s2117_s13  ;;  %1137 = vrot.lane.b32.xlu1 %v1964_v62, %s2114_s10 }
 0x1b6   : > { %1473 = vrot.lane.b32.xlu0 %v1963_v60, %s2118_s14  ;;  %1223 = vrot.lane.b32.xlu1 %v1964_v62, %s2116_s12 }
 0x1ba   : > { %1559 = vrot.lane.b32.xlu0 %v1963_v60, %s2119_s15  ;;  %1309 = vrot.lane.b32.xlu1 %v1964_v62, %s2117_s13  ;;  %s215_s13 = sand.u32 1, %s2103_s19  }
 0x1bb   : > { %s1824_s23 = scalar_lea.sflag [#allocation3], %s215_s13 }
 0x1be   : > { %1645 = vrot.lane.b32.xlu0 %v1963_v60, %s2120_s16  ;;  %1475 = vrot.lane.b32.xlu1 %v1964_v62, %s2118_s14  ;;  %s1901_s14 = sshll.u32 %s215_s13, 4 }
 0x1c2   : > { %1731 = vrot.lane.b32.xlu0 %v1963_v60, %s2121_s17  ;;  %1561 = vrot.lane.b32.xlu1 %v1964_v62, %s2119_s15  ;;  %s1962_s15 = sshll.u32 %s2175_s22, 8 }
 0x1c3   : > { %s2499_s9 = scalar_lea.hbm %s2546_s5, %s1962_s15 }
 0x1c6   : > { %1047 = vperm.xlu0 %2048, %v1044_v63   ;;  %1647 = vrot.lane.b32.xlu1 %v1964_v62, %s2120_s16  ;;  %s217_s16 = scalar_lea.vmem [#allocation2], %s1901_s14 }
 0x1ca   : > { %1733 = vrot.lane.b32.xlu1 %v1964_v62, %s2121_s17  ;;  %s1838_s17 = sshll.u32 %s217_s16, 4  ;;  %s2501_s17 = int_to_ptr.vmem [resolvable:$true] %s1838_s17 }
 0x1cb   : > { %s2049_s22 = scalar_lea.vmem %s2501_s17, 256  ;;  %p2056_p0 = scmp.lt.s32.totalorder %s2501_s17, %s2054_s26 }
 0x1cc   : > { %p2050_p11 = scmp.ne.s32.totalorder %s2501_s17, %s2049_s22  ;;  %p2057_p1 = scmp.lt.s32.totalorder %s2055_s30, %s2049_s22 }
 0x1ce   : > { %p2051_p12 = pnand %p2050_p11, %p2192_p5  ;;  %p2058_p2 = por %p2057_p1, %p2056_p0 }
 0x1d0   : > { %p2052_p13 = pneg %p2051_p12 }
 0x1d2   : > { %p2059_p3 = pnand %p2058_p2, %p2052_p13 }
 0x21c   : > { %v1051_v3 = vpop.permute.xlu1 %1050  ;;  %v1136_v4 = vpop.permute.xlu0 %1135 }
 0x220   : > { %v1053_v5 = vpop.permute.xlu1 %1052  ;;  %v1222_v15 = vpop.permute.xlu0 %1221 }
 0x221   : > { %v1054_v8 = vsel %vm272_vm1, %v1051_v3, %v1053_v5  ;;  %v1055_v9 = vsel %vm272_vm1, %v1053_v5, %v1051_v3 }
 0x222   : > { %1062 = vmatprep.subr.mxu1 %v1054_v8 }
 0x223   : > { %1931 = vmatpush1.msk.msra.mxu1 %vm230_vm2, %v1055_v9 }
 0x224   : > { %1932 = vmatmul.mubr.msk.f32.vlgmr.msra.gmra.mrb[0].mxu1 %vm278_vm3, %v1058_v11  ;;  %v1138_v12 = vpop.permute.xlu1 %1137  ;;  %v1308_v18 = vpop.permute.xlu0 %1307 }
 0x225   : > { %v1140_v13 = vsel %vm359_vm0, %v1138_v12, %v1136_v4  ;;  %v1139_v14 = vsel %vm359_vm0, %v1136_v4, %v1138_v12  ;;  %1212 = vmatprep.mubr.f32.mxu1 %v2113_v0  ;;  %vm2550_vm0 = vcmp.lt.u32.totalorder %v2325_v37, 256  ;;  %v1947_v37 = vld [vmem:[%s2544_s3 + $0x30] sm:$0xff] }
 0x226   : > { %1148 = vmatprep.subr.mxu1 %v1139_v14 }
 0x227   : > { %1934 = vmatpush1.msk.msra.mxu1 %vm234_vm4, %v1140_v13 }
 0x228   : > { %v1224_v16 = vpop.permute.xlu1 %1223  ;;  %v1474_v25 = vpop.permute.xlu0 %1473 }
 0x229   : > { %v1225_v7 = vsel %vm446_vm5, %v1222_v15, %v1224_v16  ;;  %v1226_v19 = vsel %vm446_vm5, %v1224_v16, %v1222_v15 }
 0x22a   : > { %1234 = vmatprep.subr.mxu1 %v1225_v7 }
 0x22c   : > { %1935 = vmatmul.mubr.msk.f32.vlgmr.msra.gmra.mrb[0].mxu1 %vm278_vm3, %v1933_v17  ;;  %v1310_v20 = vpop.permute.xlu1 %1309  ;;  %v1560_v29 = vpop.permute.xlu0 %1559 }
 0x22d   : > { %1937 = vmatpush1.msk.msra.mxu1 %vm238_vm7, %v1226_v19  ;;  %v1311_v10 = vsel %vm533_vm6, %v1308_v18, %v1310_v20  ;;  %1298 = vmatprep.mubr.f32.mxu1 %v2113_v0  ;;  %v1312_v23 = vsel %vm533_vm6, %v1310_v20, %v1308_v18 }
 0x22e   : > { %1320 = vmatprep.subr.mxu1 %v1311_v10 }
 0x230   : > { %v1476_v24 = vpop.permute.xlu1 %1475  ;;  %v1646_v34 = vpop.permute.xlu0 %1645 }
 0x231   : > { %v1478_v26 = vsel %vm700_vm9, %v1476_v24, %v1474_v25  ;;  %v1477_v30 = vsel %vm700_vm9, %v1474_v25, %v1476_v24 }
 0x234   : > { %1938 = vmatmul.mubr.msk.f32.vlgmr.msra.gmra.mrb[0].mxu1 %vm278_vm3, %v1936_v22  ;;  %v1562_v28 = vpop.permute.xlu1 %1561  ;;  %v1732_v39 = vpop.permute.xlu0 %1731 }
 0x235   : > { %1940 = vmatpush1.msk.msra.mxu1 %vm242_vm8, %v1312_v23  ;;  %1384 = vmatprep.mubr.f32.mxu1 %v2113_v0  ;;  %v1564_v31 = vsel %vm787_vm11, %v1562_v28, %v1560_v29  ;;  %v1563_v35 = vsel %vm787_vm11, %v1560_v29, %v1562_v28 }
 0x236   : > { %1400 = vmatprep.subr.mxu1 %v1964_v62 }
 0x238   : > { %v1648_v33 = vpop.permute.xlu1 %1647 }
 0x239   : > { %v1650_v36 = vsel %vm874_vm13, %v1648_v33, %v1646_v34  ;;  %v1649_v40 = vsel %vm874_vm13, %v1646_v34, %v1648_v33 }
 0x23c   : > { %1941 = vmatmul.mubr.msk.f32.vlgmr.msra.gmra.mrb[0].mxu1 %vm278_vm3, %v1939_v21  ;;  %v1734_v38 = vpop.permute.xlu1 %1733 }
 0x23d   : > { %1401 = vmatpush1.msra.mxu1 %v1963_v60  ;;  %1464 = vmatprep.mubr.f32.mxu1 %v2113_v0  ;;  %v1736_v41 = vsel %vm961_vm15, %v1734_v38, %v1732_v39  ;;  %v1735_v43 = vsel %vm961_vm15, %v1732_v39, %v1734_v38 }
 0x23e   : > { %1945 = vmatprep.subr.msk.mxu1 %vm249_vm10, %v1478_v26 }
 0x244   : > { %1943 = vmatmul.mubr.msk.f32.vlgmr.msra.gmra.mrb[0].mxu1 %vm278_vm3, %v1942_v27 }
 0x245   : > { %1487 = vmatpush1.msra.mxu1 %v1477_v30  ;;  %1550 = vmatprep.mubr.f32.mxu1 %v2113_v0  ;;  %v1048_v45 = vpop.permute.xlu0 %1047 }
 0x246   : > { %1948 = vmatprep.subr.msk.mxu1 %vm2550_vm0, %v1564_v31 }
 0x24c   : > { %1946 = vmatmul.mubr.msk.f32.vlgmr.msra.gmra.mrb[0].mxu1 %vm278_vm3, %v1944_v32 }
 0x24d   : > { %1573 = vmatpush1.msra.mxu1 %v1563_v35  ;;  %1636 = vmatprep.mubr.f32.mxu1 %v2113_v0 }
 0x24e   : > { %1951 = vmatprep.subr.msk.mxu1 %vm257_vm14, %v1650_v36 }
 0x254   : > { %1949 = vmatmul.mubr.msk.f32.vlgmr.msra.gmra.mrb[0].mxu1 %vm278_vm3, %v1947_v37 }
 0x255   : > { %1659 = vmatpush1.msra.mxu1 %v1649_v40  ;;  %1722 = vmatprep.mubr.f32.mxu1 %v2113_v0 }
 0x256   : > { %1954 = vmatprep.subr.msk.mxu1 %vm261_vm12, %v1736_v41 }
 0x25c   : > { %1952 = vmatmul.mubr.msk.f32.vlgmr.msra.gmra.mrb[0].mxu1 %vm278_vm3, %v1950_v42 }
 0x25d   : > { %1745 = vmatpush1.msra.mxu1 %v1735_v43  ;;  %1808 = vmatprep.mubr.f32.mxu1 %v2113_v0 }
 0x264   : > { %1955 = vmatmul.mubr.msk.f32.vlgmr.msra.gmra.mrb[0].mxu1 %vm278_vm3, %v1953_v44 }
 0x337   : > { %v1810_v46 = vpop.f32.mrb[0].mxu1 }
 0x338   : > { %v1965_v47 = vadd.f32 %v1810_v46, %v1048_v45  ;;  %v1812_v48 = vpop.f32.mrb[1].mxu1 }
 0x339   : > { %v1966_v6 = vadd.f32 %v1812_v48, %v1048_v45 }
 0x33a   : > { %v1817_v49 = vadd.f32 %v1965_v47, %v2209_v1 }
 0x33b   : > { %v1818_v0 = vadd.f32 %v1966_v6, %v2215_v2 }
 0x33c   : > { %v1819_v50 = vmax.f32 %v1817_v49, 0.0 }
 0x33d   : > { %v1820_v51 = vmax.f32 %v1818_v0, 0.0 }
 0x33e   : > { %1821 = vst [vmem:[%s217_s16] sm:$0xff] %v1819_v50 }
 0x33f   : > { %1822 = vst [vmem:[%s217_s16 + $0x8] sm:$0xff] %v1820_v51 }
 0x340   : > { %2062 = shalt.err (!%p2059_p3)
}
 0x341   : > { %s2063_s11 = scalar_lea.hbm %s2499_s9, 256  ;;  %s2067_s12 = scalar_lea.hbm %s2546_s5, 512 }
 0x342   : > { %p2064_p4 = scmp.ne.s32.totalorder %s2499_s9, %s2063_s11  ;;  %p2068_p9 = scmp.lt.u32.totalorder %s2499_s9, %s2546_s5 }
 0x343   : > { %p2069_p10 = scmp.lt.u32.totalorder %s2067_s12, %s2063_s11  ;;  %p2071_p12 = scmp.lt.u32.totalorder %s2063_s11, %s2499_s9 }
 0x344   : > { %p2065_p7 = pnand %p2064_p4, %p2192_p5 }
 0x345   : > { %p2070_p11 = por %p2069_p10, %p2068_p9 }
 0x346   : > { %p2066_p8 = pneg %p2065_p7 }
 0x347   : > { %p2072_p13 = por %p2071_p12, %p2070_p11 }
 0x349   : > { %p2073_p0 = pnand %p2072_p13, %p2066_p8 }
 0x34b   : > { %2076 = shalt.err (!%p2073_p0)
}
 0x34c   : > { %1999 = dma.vmem_to_hbm [thread:$0]  (%p2192_p5), %s2501_s17, 256, %s2499_s9, %s1824_s23  }
 0x34d PF: > { %p2005_p1 = scmp.ge.s32.totalorder %s2111_s21, 2  ;;  %s1850_s15 = sand.u32 1, %s2099_s18  }
 0x34e   : > { %s1851_s16 = scalar_lea.sflag [#allocation3], %s1850_s15 }
 0x34f   : > { %p2002_p2 = pnand %p2005_p1, %p2196_p6 }
 0x351   : > { %2094 = dma.done.wait (!%p2002_p2), %s1851_s16, 256  }
 0x352   : > { %2096 = vsyncadd (!%p2002_p2), %s1851_s16, 4294967040  ;;  %p15_p3 = scmp.ge.s32.totalorder %s2179_s24, 4   ;;  %s2551_s18 = smov %s2103_s19 }
 0x353   : > { %s2552_s19 = smov %s2107_s20  ;;  %s2553_s20 = smov %s2190_s27 }
 0x354   : > { %s2554_s21 = smov %s2179_s24  ;;  %17 = sbr.rel (!%p15_p3) target bundleno = 3 (0x3), region = 91 }
 0x35b   :  { %1856 = vsyncpa [#allocation3], 1 }
 0x35c   :  { %1858 = vsyncpa [#allocation3 + $0x1], 1 }

</bundles_post_ra>
